<compile_context>
chip_gen: v6e
topology: v6e:2x2x1
jax: 0.10.0
libtpu: 0.0.40
codegen_flags: <defaults>
</compile_context>

<pallas_src>
import math

import jax
import jax.numpy as jnp
from jax.experimental import pallas as pl
from jax.experimental.pallas import tpu as pltpu


# ---------------------------------------------------------------------------
# Kernel
# ---------------------------------------------------------------------------
def make_mlp_kernel(n_chunks, chunk_rows, compute_dtype):
    cdt = compute_dtype

    def mlp_kernel(x_ref, w1_ref, b1_ref, w2_ref, b2_ref,
                   w3_ref, b3_ref, w4_ref, b4_ref, o_ref):
        # Hoist the small resident weights/biases once per grid step.
        w1 = w1_ref[...]; b1 = b1_ref[...]
        w2 = w2_ref[...]; b2 = b2_ref[...]
        w3 = w3_ref[...]; b3 = b3_ref[...]
        w4 = w4_ref[...]; b4 = b4_ref[...]

        # Static unroll over independent row sub-chunks: the chains have no data
        # dependence on each other, so the LLO scheduler can interleave chunk
        # B's matmul pushes with chunk A's MXU-result drain/cast (v5e/v6e MRF).
        for c in range(n_chunks):
            r0 = c * chunk_rows
            # Cast to the matmul-operand dtype in-kernel (f32 x at the boundary).
            x = x_ref[pl.ds(r0, chunk_rows), :].astype(cdt)

            # fc1 (no activation in the reference forward); f32 accumulation.
            h = jnp.dot(x, w1, preferred_element_type=jnp.float32) + b1

            # relu(fc2) -- elementwise stays f32 (v5e has no bf16 VPU/EUP path).
            h = jnp.dot(h.astype(cdt), w2, preferred_element_type=jnp.float32) + b2
            h = jnp.maximum(h, 0.0)

            # dropout: inference/eval semantics -> identity.
            # TODO(synk): training-mode dropout (pltpu.prng_seed +
            #             prng_random_bits mask, scale by 1/(1-p)) if needed.

            # relu(fc3)
            h = jnp.dot(h.astype(cdt), w3, preferred_element_type=jnp.float32) + b3
            h = jnp.maximum(h, 0.0)

            # tanh(fc4) -- output columns are zero-padded to a lane-dense width;
            # padded lanes hold tanh(0.0 + pad-bias 0.0) = 0 and are sliced off
            # in the (jit-fused) wrapper.
            h = jnp.dot(h.astype(cdt), w4, preferred_element_type=jnp.float32) + b4
            o_ref[pl.ds(r0, chunk_rows), :] = jnp.tanh(h).astype(o_ref.dtype)

    return mlp_kernel


# ---------------------------------------------------------------------------
# Wrapper
# ---------------------------------------------------------------------------
def _pick_tile_b(batch, row_align):
    """Largest batch tile that divides the batch, respects sublane packing, and
    leaves grid >= 4 so the BlockSpec pipeline reaches steady state (and each
    v7x TensorCore gets >= 2 steps)."""
    for cand in (512, 256, 128, 64, 32, 16, 8):
        if cand <= batch and cand % row_align == 0 and batch % cand == 0 \
                and batch // cand >= 4:
            return cand
    # Fallback: deepest grid we can get while keeping alignment.
    for cand in (8, 16, 32, 64, 128, 256, 512):
        if cand <= batch and cand % row_align == 0 and batch % cand == 0:
            return cand
    return batch


def prepare_params(params, *, use_bf16=True):
    """One-time weight prep: lane-dense pad of the last layer + operand casts.
    Returns (prepped_arrays, static_meta)."""
    cdt = jnp.bfloat16 if use_bf16 else jnp.float32
    out_size = params["w4"].shape[1]
    out_pad = max(128, ((out_size + 127) // 128) * 128)
    pad_n = out_pad - out_size

    w4, b4 = params["w4"], params["b4"]
    if pad_n:
        w4 = jnp.pad(w4, ((0, 0), (0, pad_n)))
        b4 = jnp.pad(b4, ((0, 0), (0, pad_n)))

    prepped = {
        "w1": params["w1"].astype(cdt), "b1": params["b1"].astype(jnp.float32),
        "w2": params["w2"].astype(cdt), "b2": params["b2"].astype(jnp.float32),
        "w3": params["w3"].astype(cdt), "b3": params["b3"].astype(jnp.float32),
        "w4": w4.astype(cdt),           "b4": b4.astype(jnp.float32),
    }
    meta = {"out_size": out_size, "out_pad": out_pad, "compute_dtype": cdt}
    return prepped, meta


def mlp_forward(x, prepped, meta, *, tile_b=None):
    """x: (B, input_size) f32.  prepped/meta from prepare_params()."""
    B, in_size = x.shape
    cdt = meta["compute_dtype"]
    out_size, out_pad = meta["out_size"], meta["out_pad"]
    hidden = prepped["w1"].shape[1]

    row_align = 32 // jnp.dtype(cdt).itemsize        # 16 for bf16, 8 for f32
    if tile_b is None:
        tile_b = _pick_tile_b(B, row_align)
    assert B % tile_b == 0
    grid = (B // tile_b,)

    # In-kernel row sub-chunking (two independent MXU chains per grid step).
    if tile_b >= 256 and tile_b % 128 == 0:
        chunk_rows = 128
    elif tile_b >= 2 * row_align and tile_b % (2 * row_align) == 0:
        chunk_rows = tile_b // 2
    else:
        chunk_rows = tile_b
    n_chunks = tile_b // chunk_rows

    kernel = make_mlp_kernel(n_chunks, chunk_rows, cdt)

    def nbytes(a):
        return a.size * a.dtype.itemsize

    weight_bytes = sum(nbytes(prepped[k]) for k in ("w1", "w2", "w3", "w4"))
    bias_bytes = sum(nbytes(prepped[k]) for k in ("b1", "b2", "b3", "b4"))
    x_tile_bytes = tile_b * in_size * x.dtype.itemsize
    o_tile_bytes = tile_b * out_pad * x.dtype.itemsize
    h_bytes = 2 * n_chunks * chunk_rows * max(hidden, out_pad) * 4
    need = (2 * (x_tile_bytes + o_tile_bytes)          # double-buffered x/out tiles
            + 2 * (weight_bytes + bias_bytes)          # resident weight blocks
            + h_bytes)                                 # f32 intermediates headroom

    # Generation-aware VMEM budget: 64 MiB/TC on v7x, 128 MiB on v5e/v6e; leave
    # headroom for compiler-internal scratch.
    try:
        vmem_cap = int(pltpu.get_tpu_info().vmem_capacity_bytes)
    except Exception:
        vmem_cap = 64 << 20
    vmem_limit = int(min(max(2 * need + (8 << 20), 32 << 20),
                         max(vmem_cap - (8 << 20), 16 << 20)))

    def const_spec(a):
        # Constant block index -> Mosaic skips re-DMA across grid steps.
        return pl.BlockSpec(a.shape, lambda i: (0,) * a.ndim)

    out = pl.pallas_call(
        kernel,
        out_shape=jax.ShapeDtypeStruct((B, out_pad), x.dtype),
        grid_spec=pltpu.PrefetchScalarGridSpec(
            num_scalar_prefetch=0,
            grid=grid,
            in_specs=[
                pl.BlockSpec((tile_b, in_size), lambda i: (i, 0)),
                const_spec(prepped["w1"]), const_spec(prepped["b1"]),
                const_spec(prepped["w2"]), const_spec(prepped["b2"]),
                const_spec(prepped["w3"]), const_spec(prepped["b3"]),
                const_spec(prepped["w4"]), const_spec(prepped["b4"]),
            ],
            out_specs=pl.BlockSpec((tile_b, out_pad), lambda i: (i, 0)),
        ),
        compiler_params=pltpu.CompilerParams(
            dimension_semantics=("parallel",),
            vmem_limit_bytes=vmem_limit),
    )(x, prepped["w1"], prepped["b1"], prepped["w2"], prepped["b2"],
      prepped["w3"], prepped["b3"], prepped["w4"], prepped["b4"])

    # Under jit this slice fuses with the pallas_call's output.
    return out[:, :out_size] if out_pad != out_size else out


# ---------------------------------------------------------------------------
# Parameter init + pure-JAX reference (for the self-test)
# ---------------------------------------------------------------------------
def kaiming_uniform(key, fan_in, fan_out):
    # torch.nn.init.kaiming_uniform_(a=0, mode='fan_in', nonlinearity='leaky_relu')
    gain = math.sqrt(2.0)
    bound = gain * math.sqrt(3.0 / fan_in)
    # stored as (in, out); same elementwise-iid uniform as PyTorch's (out, in)
    return jax.random.uniform(key, (fan_in, fan_out), jnp.float32, -bound, bound)


def init_params(key, input_size, hidden_size, output_size):
    ks = jax.random.split(key, 4)
    dims = [(input_size, hidden_size), (hidden_size, hidden_size),
            (hidden_size, hidden_size), (hidden_size, output_size)]
    params = {}
    for n, (k, (fi, fo)) in enumerate(zip(ks, dims), start=1):
        params[f"w{n}"] = kaiming_uniform(k, fi, fo)
        params[f"b{n}"] = jnp.full((1, fo), 0.01, jnp.float32)  # bias.data.fill_(0.01)
    return params


def mlp_ref(x, p, cdt=jnp.float32):
    """Reference with the same arithmetic as the kernel (cdt matmul operands,
    f32 accumulation, f32 elementwise)."""
    f = lambda a: a.astype(cdt)
    h = jnp.dot(f(x), f(p["w1"]), preferred_element_type=jnp.float32) + p["b1"]
    h = jnp.maximum(jnp.dot(f(h), f(p["w2"]),
                            preferred_element_type=jnp.float32) + p["b2"], 0.0)
    h = jnp.maximum(jnp.dot(f(h), f(p["w3"]),
                            preferred_element_type=jnp.float32) + p["b3"], 0.0)
    return jnp.tanh(jnp.dot(f(h), f(p["w4"]),
                            preferred_element_type=jnp.float32) + p["b4"])


if __name__ == "__main__":
    key = jax.random.PRNGKey(0)
    k_x, k_p = jax.random.split(key)

    # Batch large enough for grid >= 4 (steady-state pipeline, v7x megacore);
    # feature sizes match the module spec.
    batch, input_size, hidden_size, output_size = 512, 32, 32, 16
    dropout = 0.1  # eval-mode -> identity

    x = jax.random.normal(k_x, (batch, input_size), jnp.float32)
    params = init_params(k_p, input_size, hidden_size, output_size)

    # Fast path: bf16 matmul operands, f32 accumulation. Weight prep is done once.
    prepped, meta = prepare_params(params, use_bf16=True)
    fwd = jax.jit(lambda xx: mlp_forward(xx, prepped, meta))
    out = jax.block_until_ready(fwd(x))
    assert out.shape == (batch, output_size)

    ref_bf16 = mlp_ref(x, params, jnp.bfloat16)   # same arithmetic as the kernel
    ref_f32 = mlp_ref(x, params, jnp.float32)
    assert jnp.allclose(out, ref_bf16, atol=5e-3, rtol=5e-3)
    assert jnp.allclose(out, ref_f32, atol=1e-1, rtol=1e-1)

    # Pure-f32 path must match the f32 reference tightly.
    prepped32, meta32 = prepare_params(params, use_bf16=False)
    fwd32 = jax.jit(lambda xx: mlp_forward(xx, prepped32, meta32))
    out32 = jax.block_until_ready(fwd32(x))
    assert out32.shape == (batch, output_size)
    assert jnp.allclose(out32, ref_f32, atol=1e-4, rtol=1e-4)

    print("KERNEL_OK")
</pallas_src>

<mosaic_0001>
module attributes {stable_mosaic.version = 11 : i64} {
  func.func @mlp_kernel(%arg0: i32, %arg1: memref<128x32xf32, #tpu.memory_space<vmem>>, %arg2: memref<32x32xbf16, #tpu.memory_space<vmem>>, %arg3: memref<1x32xf32, #tpu.memory_space<vmem>>, %arg4: memref<32x32xbf16, #tpu.memory_space<vmem>>, %arg5: memref<1x32xf32, #tpu.memory_space<vmem>>, %arg6: memref<32x32xbf16, #tpu.memory_space<vmem>>, %arg7: memref<1x32xf32, #tpu.memory_space<vmem>>, %arg8: memref<32x128xbf16, #tpu.memory_space<vmem>>, %arg9: memref<1x128xf32, #tpu.memory_space<vmem>>, %arg10: memref<128x128xf32, #tpu.memory_space<vmem>>) attributes {dimension_semantics = [#tpu.dimension_semantics<parallel>], iteration_bounds = array<i64: 4>, scalar_prefetch = 0 : i64, scratch_operands = 0 : i64, tpu.core_type = #tpu.core_type<tc>, window_params = [{transform_indices = @transform_0, window_bounds = array<i64: 128, 32>}, {pipeline_mode = #tpu.pipeline_mode<synchronous>, transform_indices = @transform_1, window_bounds = array<i64: 32, 32>}, {pipeline_mode = #tpu.pipeline_mode<synchronous>, transform_indices = @transform_2, window_bounds = array<i64: 1, 32>}, {pipeline_mode = #tpu.pipeline_mode<synchronous>, transform_indices = @transform_3, window_bounds = array<i64: 32, 32>}, {pipeline_mode = #tpu.pipeline_mode<synchronous>, transform_indices = @transform_4, window_bounds = array<i64: 1, 32>}, {pipeline_mode = #tpu.pipeline_mode<synchronous>, transform_indices = @transform_5, window_bounds = array<i64: 32, 32>}, {pipeline_mode = #tpu.pipeline_mode<synchronous>, transform_indices = @transform_6, window_bounds = array<i64: 1, 32>}, {pipeline_mode = #tpu.pipeline_mode<synchronous>, transform_indices = @transform_7, window_bounds = array<i64: 32, 128>}, {pipeline_mode = #tpu.pipeline_mode<synchronous>, transform_indices = @transform_8, window_bounds = array<i64: 1, 128>}, {transform_indices = @transform_9, window_bounds = array<i64: 128, 128>}]} {
    %c0 = arith.constant 0 : index
    %c0_0 = arith.constant 0 : index
    %0 = vector.load %arg2[%c0, %c0_0] : memref<32x32xbf16, #tpu.memory_space<vmem>>, vector<32x32xbf16>
    %c0_1 = arith.constant 0 : index
    %c0_2 = arith.constant 0 : index
    %1 = vector.load %arg3[%c0_1, %c0_2] : memref<1x32xf32, #tpu.memory_space<vmem>>, vector<1x32xf32>
    %c0_3 = arith.constant 0 : index
    %c0_4 = arith.constant 0 : index
    %2 = vector.load %arg4[%c0_3, %c0_4] : memref<32x32xbf16, #tpu.memory_space<vmem>>, vector<32x32xbf16>
    %c0_5 = arith.constant 0 : index
    %c0_6 = arith.constant 0 : index
    %3 = vector.load %arg5[%c0_5, %c0_6] : memref<1x32xf32, #tpu.memory_space<vmem>>, vector<1x32xf32>
    %c0_7 = arith.constant 0 : index
    %c0_8 = arith.constant 0 : index
    %4 = vector.load %arg6[%c0_7, %c0_8] : memref<32x32xbf16, #tpu.memory_space<vmem>>, vector<32x32xbf16>
    %c0_9 = arith.constant 0 : index
    %c0_10 = arith.constant 0 : index
    %5 = vector.load %arg7[%c0_9, %c0_10] : memref<1x32xf32, #tpu.memory_space<vmem>>, vector<1x32xf32>
    %c0_11 = arith.constant 0 : index
    %c0_12 = arith.constant 0 : index
    %6 = vector.load %arg8[%c0_11, %c0_12] : memref<32x128xbf16, #tpu.memory_space<vmem>>, vector<32x128xbf16>
    %c0_13 = arith.constant 0 : index
    %c0_14 = arith.constant 0 : index
    %7 = vector.load %arg9[%c0_13, %c0_14] : memref<1x128xf32, #tpu.memory_space<vmem>>, vector<1x128xf32>
    %c0_15 = arith.constant 0 : index
    %c0_16 = arith.constant 0 : index
    %8 = vector.load %arg1[%c0_15, %c0_16] : memref<128x32xf32, #tpu.memory_space<vmem>>, vector<64x32xf32>
    %9 = arith.truncf %8 : vector<64x32xf32> to vector<64x32xbf16>
    %cst = arith.constant dense<0.000000e+00> : vector<64x32xf32>
    %10 = tpu.matmul %9, %0, %cst {dimension_numbers = #tpu.dot_dimension_numbers<[1], [0], [0], [1], [0, 0, 1, 1], [], []>} : vector<64x32xbf16>, vector<32x32xbf16>, vector<64x32xf32> -> vector<64x32xf32>
    %11 = vector.broadcast %1 : vector<1x32xf32> to vector<64x32xf32>
    %12 = arith.addf %10, %11 : vector<64x32xf32>
    %13 = arith.truncf %12 : vector<64x32xf32> to vector<64x32xbf16>
    %cst_17 = arith.constant dense<0.000000e+00> : vector<64x32xf32>
    %14 = tpu.matmul %13, %2, %cst_17 {dimension_numbers = #tpu.dot_dimension_numbers<[1], [0], [0], [1], [0, 0, 1, 1], [], []>} : vector<64x32xbf16>, vector<32x32xbf16>, vector<64x32xf32> -> vector<64x32xf32>
    %15 = vector.broadcast %3 : vector<1x32xf32> to vector<64x32xf32>
    %16 = arith.addf %14, %15 : vector<64x32xf32>
    %cst_18 = arith.constant 0.000000e+00 : f32
    %17 = vector.broadcast %cst_18 : f32 to vector<64x32xf32>
    %18 = arith.maximumf %16, %17 : vector<64x32xf32>
    %19 = arith.truncf %18 : vector<64x32xf32> to vector<64x32xbf16>
    %cst_19 = arith.constant dense<0.000000e+00> : vector<64x32xf32>
    %20 = tpu.matmul %19, %4, %cst_19 {dimension_numbers = #tpu.dot_dimension_numbers<[1], [0], [0], [1], [0, 0, 1, 1], [], []>} : vector<64x32xbf16>, vector<32x32xbf16>, vector<64x32xf32> -> vector<64x32xf32>
    %21 = vector.broadcast %5 : vector<1x32xf32> to vector<64x32xf32>
    %22 = arith.addf %20, %21 : vector<64x32xf32>
    %cst_20 = arith.constant 0.000000e+00 : f32
    %23 = vector.broadcast %cst_20 : f32 to vector<64x32xf32>
    %24 = arith.maximumf %22, %23 : vector<64x32xf32>
    %25 = arith.truncf %24 : vector<64x32xf32> to vector<64x32xbf16>
    %cst_21 = arith.constant dense<0.000000e+00> : vector<64x128xf32>
    %26 = tpu.matmul %25, %6, %cst_21 {dimension_numbers = #tpu.dot_dimension_numbers<[1], [0], [0], [1], [0, 0, 1, 1], [], []>} : vector<64x32xbf16>, vector<32x128xbf16>, vector<64x128xf32> -> vector<64x128xf32>
    %27 = vector.broadcast %7 : vector<1x128xf32> to vector<64x128xf32>
    %28 = arith.addf %26, %27 : vector<64x128xf32>
    %29 = math.tanh %28 : vector<64x128xf32>
    %c0_22 = arith.constant 0 : index
    %c0_23 = arith.constant 0 : index
    %30 = vector.load %arg10[%c0_22, %c0_23] : memref<128x128xf32, #tpu.memory_space<vmem>>, vector<64x128xf32>
    tpu.vector_store %arg10[%c0_22, %c0_23], %29 {strides = array<i32>} : memref<128x128xf32, #tpu.memory_space<vmem>>, vector<64x128xf32>,
    %c64 = arith.constant 64 : index
    %c0_24 = arith.constant 0 : index
    %31 = vector.load %arg1[%c64, %c0_24] : memref<128x32xf32, #tpu.memory_space<vmem>>, vector<64x32xf32>
    %32 = arith.truncf %31 : vector<64x32xf32> to vector<64x32xbf16>
    %cst_25 = arith.constant dense<0.000000e+00> : vector<64x32xf32>
    %33 = tpu.matmul %32, %0, %cst_25 {dimension_numbers = #tpu.dot_dimension_numbers<[1], [0], [0], [1], [0, 0, 1, 1], [], []>} : vector<64x32xbf16>, vector<32x32xbf16>, vector<64x32xf32> -> vector<64x32xf32>
    %34 = vector.broadcast %1 : vector<1x32xf32> to vector<64x32xf32>
    %35 = arith.addf %33, %34 : vector<64x32xf32>
    %36 = arith.truncf %35 : vector<64x32xf32> to vector<64x32xbf16>
    %cst_26 = arith.constant dense<0.000000e+00> : vector<64x32xf32>
    %37 = tpu.matmul %36, %2, %cst_26 {dimension_numbers = #tpu.dot_dimension_numbers<[1], [0], [0], [1], [0, 0, 1, 1], [], []>} : vector<64x32xbf16>, vector<32x32xbf16>, vector<64x32xf32> -> vector<64x32xf32>
    %38 = vector.broadcast %3 : vector<1x32xf32> to vector<64x32xf32>
    %39 = arith.addf %37, %38 : vector<64x32xf32>
    %cst_27 = arith.constant 0.000000e+00 : f32
    %40 = vector.broadcast %cst_27 : f32 to vector<64x32xf32>
    %41 = arith.maximumf %39, %40 : vector<64x32xf32>
    %42 = arith.truncf %41 : vector<64x32xf32> to vector<64x32xbf16>
    %cst_28 = arith.constant dense<0.000000e+00> : vector<64x32xf32>
    %43 = tpu.matmul %42, %4, %cst_28 {dimension_numbers = #tpu.dot_dimension_numbers<[1], [0], [0], [1], [0, 0, 1, 1], [], []>} : vector<64x32xbf16>, vector<32x32xbf16>, vector<64x32xf32> -> vector<64x32xf32>
    %44 = vector.broadcast %5 : vector<1x32xf32> to vector<64x32xf32>
    %45 = arith.addf %43, %44 : vector<64x32xf32>
    %cst_29 = arith.constant 0.000000e+00 : f32
    %46 = vector.broadcast %cst_29 : f32 to vector<64x32xf32>
    %47 = arith.maximumf %45, %46 : vector<64x32xf32>
    %48 = arith.truncf %47 : vector<64x32xf32> to vector<64x32xbf16>
    %cst_30 = arith.constant dense<0.000000e+00> : vector<64x128xf32>
    %49 = tpu.matmul %48, %6, %cst_30 {dimension_numbers = #tpu.dot_dimension_numbers<[1], [0], [0], [1], [0, 0, 1, 1], [], []>} : vector<64x32xbf16>, vector<32x128xbf16>, vector<64x128xf32> -> vector<64x128xf32>
    %50 = vector.broadcast %7 : vector<1x128xf32> to vector<64x128xf32>
    %51 = arith.addf %49, %50 : vector<64x128xf32>
    %52 = math.tanh %51 : vector<64x128xf32>
    %c64_31 = arith.constant 64 : index
    %c0_32 = arith.constant 0 : index
    %53 = vector.load %arg10[%c64_31, %c0_32] : memref<128x128xf32, #tpu.memory_space<vmem>>, vector<64x128xf32>
    tpu.vector_store %arg10[%c64_31, %c0_32], %52 {strides = array<i32>} : memref<128x128xf32, #tpu.memory_space<vmem>>, vector<64x128xf32>,
    return
  }
  func.func @transform_0(%arg0: i32) -> (i32, i32) {
    %c0_i32 = arith.constant 0 : i32
    %c0_i32_0 = arith.constant 0 : i32
    return %arg0, %c0_i32 : i32, i32
  }
  func.func @transform_1(%arg0: i32) -> (i32, i32) {
    %c0_i32 = arith.constant 0 : i32
    %c0_i32_0 = arith.constant 0 : i32
    %c0_i32_1 = arith.constant 0 : i32
    return %c0_i32, %c0_i32_0 : i32, i32
  }
  func.func @transform_2(%arg0: i32) -> (i32, i32) {
    %c0_i32 = arith.constant 0 : i32
    %c0_i32_0 = arith.constant 0 : i32
    %c0_i32_1 = arith.constant 0 : i32
    return %c0_i32, %c0_i32_0 : i32, i32
  }
  func.func @transform_3(%arg0: i32) -> (i32, i32) {
    %c0_i32 = arith.constant 0 : i32
    %c0_i32_0 = arith.constant 0 : i32
    %c0_i32_1 = arith.constant 0 : i32
    return %c0_i32, %c0_i32_0 : i32, i32
  }
  func.func @transform_4(%arg0: i32) -> (i32, i32) {
    %c0_i32 = arith.constant 0 : i32
    %c0_i32_0 = arith.constant 0 : i32
    %c0_i32_1 = arith.constant 0 : i32
    return %c0_i32, %c0_i32_0 : i32, i32
  }
  func.func @transform_5(%arg0: i32) -> (i32, i32) {
    %c0_i32 = arith.constant 0 : i32
    %c0_i32_0 = arith.constant 0 : i32
    %c0_i32_1 = arith.constant 0 : i32
    return %c0_i32, %c0_i32_0 : i32, i32
  }
  func.func @transform_6(%arg0: i32) -> (i32, i32) {
    %c0_i32 = arith.constant 0 : i32
    %c0_i32_0 = arith.constant 0 : i32
    %c0_i32_1 = arith.constant 0 : i32
    return %c0_i32, %c0_i32_0 : i32, i32
  }
  func.func @transform_7(%arg0: i32) -> (i32, i32) {
    %c0_i32 = arith.constant 0 : i32
    %c0_i32_0 = arith.constant 0 : i32
    %c0_i32_1 = arith.constant 0 : i32
    return %c0_i32, %c0_i32_0 : i32, i32
  }
  func.func @transform_8(%arg0: i32) -> (i32, i32) {
    %c0_i32 = arith.constant 0 : i32
    %c0_i32_0 = arith.constant 0 : i32
    %c0_i32_1 = arith.constant 0 : i32
    return %c0_i32, %c0_i32_0 : i32, i32
  }
  func.func @transform_9(%arg0: i32) -> (i32, i32) {
    %c0_i32 = arith.constant 0 : i32
    %c0_i32_0 = arith.constant 0 : i32
    return %arg0, %c0_i32 : i32, i32
  }
}

</mosaic_0001>

<bundles_post_ra>
// kernel: _lambda_.1
= control target key start
LH: loop header
LB: loop body
LE: loop exit
PB: predicated region body
PF: predicated region fallthrough
CT: control target
= control target key end

     0   :  { %s1519_s30 = smov 0   ;;  %s1761_s0 = inlined_call_operand.vmem [shape: f32[512,32], index: 0, kind: input, shape index: {}]   ;;  %s1762_s1 = inlined_call_operand.vmem [shape: bf16[32,32], index: 1, kind: input, shape index: {}]   ;;  %s1763_s2 = inlined_call_operand.vmem [shape: f32[1,32], index: 2, kind: input, shape index: {}, may-alias: {2,4,6}]   ;;  %s1764_s3 = inlined_call_operand.vmem [shape: bf16[32,32], index: 3, kind: input, shape index: {}]   ;;  %s1765_s4 = inlined_call_operand.vmem [shape: f32[1,32], index: 4, kind: input, shape index: {}, may-alias: {2,4,6}]   ;;  %s1766_s5 = inlined_call_operand.vmem [shape: bf16[32,32], index: 5, kind: input, shape index: {}]   ;;  %s1767_s6 = inlined_call_operand.vmem [shape: f32[1,32], index: 6, kind: input, shape index: {}, may-alias: {2,4,6}]   ;;  %s1768_s7 = inlined_call_operand.vmem [shape: bf16[32,128], index: 7, kind: input, shape index: {}]   ;;  %s1769_s8 = inlined_call_operand.vmem [shape: f32[1,128], index: 8, kind: input, shape index: {}]   ;;  %s1770_s9 = inlined_call_operand.vmem [shape: f32[512,128], index: 9, kind: output, shape index: {}]  }
   0x1 LB: > { %s1214_s10 = sadd.s32 4294967295, %s1467_s30   ;;  %p1218_p0 = scmp.ge.s32.totalorder %s1467_s30, 1  ;;  %s1467_s30 = sphi %s1519_s30, %s19_s30  }
   0x2   : > { %p288_p1 = scmp.lt.s32.totalorder %s1467_s30, 5 }
   0x4   : > { %p289_p2 = pnand %p1218_p0, %p288_p1 }
   0x5   : > { %s1219_s13 = sshll.u32 (!%p289_p2), %s1214_s10, 4 }
   0x6   : > { %292 = sbr.rel (%p289_p2) target bundleno = 1288 (0x508), region = 56  ;;  %p325_p3 = scmp.lt.s32.totalorder (!%p289_p2), %s1219_s13, 63 }
   0xb   : > { %v1530_v0 = vld [vmem:[%s1762_s1 + $0x8] sm:$0xff]   ;;  %v1535_v1 = vld [vmem:[%s1762_s1] sm:$0xff]   ;;  %s1772_s13 = smov (!%p325_p3, %s1219_s13), 63  ;;  %vm387_vm0 = vcmask 261120  }
   0xc   : > { %1317 = vmatprep.subr.bf16.mxu0 %v1530_v0  ;;  %s1220_s16 = sshll.u32 %s1772_s13, 3  ;;  %v1566_v14 = vld [vmem:[%s1764_s3 + $0x8] sm:$0xff]   ;;  %v1573_v15 = vld [vmem:[%s1764_s3] sm:$0xff]  }
   0xd   : > { %1318 = vmatpush3.bf16.msra.mxu0 %v1530_v0  ;;  %s1548_s19 = scalar_lea.vmem %s1761_s0, %s1220_s16  ;;  %1329 = vmatprep.subr.bf16.mxu1 %v1566_v14  ;;  %v1580_v16 = vld [vmem:[%s1766_s5 + $0x8] sm:$0xff]   ;;  %v1587_v20 = vld [vmem:[%s1763_s2] ss:$0 sm:$0xff]  ;;  %s1707_s24 = scalar_lea.vmem %s1770_s9, %s1220_s16 }
   0xe   : > { %1319 = vmatprep.subr.bf16.mxu0 %v1535_v1  ;;  %v357_v2 = vld [vmem:[%s1548_s19] sm:$0xff]  ;;  %v358_v3 = vld [vmem:[%s1548_s19 + $0x8] sm:$0xff]  ;;  %v359_v4 = vld [vmem:[%s1548_s19 + $0x10] sm:$0xff]  ;;  %1330 = vmatpush3.bf16.msra.mxu1 %v1566_v14 }
   0xf   : > { %v365_v5 = vpack.c.bf16 %v358_v3, %v357_v2  ;;  %v360_v6 = vld [vmem:[%s1548_s19 + $0x18] sm:$0xff]  ;;  %v361_v7 = vld [vmem:[%s1548_s19 + $0x20] sm:$0xff]  ;;  %v362_v8 = vld [vmem:[%s1548_s19 + $0x28] sm:$0xff]  ;;  %1331 = vmatprep.subr.bf16.mxu1 %v1573_v15 }
  0x10   : > { %v366_v9 = vpack.c.bf16 %v360_v6, %v359_v4  ;;  %v367_v10 = vpack.c.bf16 %v362_v8, %v361_v7  ;;  %v363_v11 = vld [vmem:[%s1548_s19 + $0x30] sm:$0xff]  ;;  %v364_v12 = vld [vmem:[%s1548_s19 + $0x38] sm:$0xff]  ;;  %v1426_v38 = vld [vmem:[%s1766_s5] sm:$0xff]  }
  0x11   : > { %1320 = vmatpush3.bf16.msra.mxu0 %v1535_v1  ;;  %1321 = vmatprep.mubr.msk.bf16.mxu0 %vm387_vm0, %v365_v5  ;;  %v368_v13 = vpack.c.bf16 %v364_v12, %v363_v11  ;;  %v1608_v39 = vld [vmem:[%s1768_s7 + $0x8] sm:$0xff]   ;;  %v1615_v42 = vld [vmem:[%s1765_s4] ss:$0 sm:$0xff] }
  0x12   : > { %1332 = vmatpush3.bf16.msra.mxu1 %v1573_v15  ;;  %1341 = vmatprep.subr.bf16.mxu0 %v1580_v16  ;;  %v794_v2 = vld [vmem:[%s1548_s19 + $0x40] sm:$0xff]  ;;  %v795_v3 = vld [vmem:[%s1548_s19 + $0x48] sm:$0xff] }
  0x13   : > { %1353 = vmatprep.subr.bf16.mxu1 %v1608_v39  ;;  %v802_v8 = vpack.c.bf16 %v795_v3, %v794_v2  ;;  %v798_v11 = vld [vmem:[%s1548_s19 + $0x60] sm:$0xff]  ;;  %v799_v12 = vld [vmem:[%s1548_s19 + $0x68] sm:$0xff] }
  0x14   : > { %1322 = vmatmul.mubr.msk.bf16.vlgmr.msra.gmra.mxu0 %vm387_vm0, %v366_v9 }
  0x15   : > { %1325 = vmatprep.mubr.msk.bf16.mxu0 %vm387_vm0, %v367_v10  ;;  %1342 = vmatpush3.bf16.msra.mxu0 %v1580_v16  ;;  %v797_v10 = vld [vmem:[%s1548_s19 + $0x58] sm:$0xff] }
  0x16   : > { %1343 = vmatprep.subr.bf16.mxu0 %v1426_v38 }
  0x19   : > { %1344 = vmatpush3.bf16.msra.mxu0 %v1426_v38 }
  0x1a   : > { %1365 = vmatprep.subr.bf16.mxu0 %v1530_v0 }
  0x1c   : > { %1326 = vmatmul.mubr.msk.bf16.gmra.mxu0 %vm387_vm0, %v368_v13 }
  0xd4   : > { %v1323_v17 = vpop.f32.mrf.mxu0 }
  0xd5   : > { %v443_v25 = vadd.f32 %v1323_v17, %v1587_v20  ;;  %v804_v17 = vpack.c.bf16 %v799_v12, %v798_v11 }
  0xd6   : > { %v434_v18 = vpop.f32.mrf.mxu0 }
  0xd7   : > { %v435_v23 = vadd.f32 %v1587_v20, %v434_v18  ;;  %v801_v18 = vld [vmem:[%s1548_s19 + $0x78] sm:$0xff] }
  0xd8   : > { %v1324_v19 = vpop.f32.mrf.mxu0 }
  0xd9   : > { %v446_v21 = vadd.f32 %v1324_v19, %v1587_v20 }
  0xda   : > { %v437_v22 = vpop.f32.mrf.mxu0 }
  0xdb   : > { %v438_v24 = vadd.f32 %v1587_v20, %v437_v22  ;;  %v466_v28 = vpack.c.bf16 %v446_v21, %v443_v25  ;;  %v1649_v21 = vld [vmem:[%s1768_s7] sm:$0xff]  }
  0xdc   : > { %v1327_v26 = vpop.f32.mrf.mxu0 }
  0xdd   : > { %v465_v27 = vpack.c.bf16 %v438_v24, %v435_v23  ;;  %v459_v35 = vadd.f32 %v1327_v26, %v1587_v20 }
  0xde   : > { %v450_v29 = vpop.f32.mrf.mxu0 }
  0xdf   : > { %1333 = vmatprep.mubr.msk.bf16.mxu1 %vm387_vm0, %v465_v27  ;;  %v451_v33 = vadd.f32 %v1587_v20, %v450_v29 }
  0xe0   : > { %v1328_v30 = vpop.f32.mrf.mxu0  ;;  %1334 = vmatmul.mubr.msk.bf16.vlgmr.msra.gmra.mxu1 %vm387_vm0, %v466_v28 }
  0xe1   : > { %v462_v31 = vadd.f32 %v1328_v30, %v1587_v20  ;;  %1354 = vmatpush3.bf16.msra.mxu1 %v1608_v39 }
  0xe2   : > { %v453_v32 = vpop.f32.mrf.mxu0  ;;  %1355 = vmatprep.subr.bf16.mxu1 %v1649_v21 }
  0xe3   : > { %v454_v34 = vadd.f32 %v1587_v20, %v453_v32  ;;  %v468_v37 = vpack.c.bf16 %v462_v31, %v459_v35 }
  0xe5   : > { %v467_v36 = vpack.c.bf16 %v454_v34, %v451_v33  ;;  %1356 = vmatpush3.bf16.msra.mxu1 %v1649_v21 }
  0xe6   : > { %1377 = vmatprep.subr.bf16.mxu1 %v1566_v14 }
  0xe7   : > { %1337 = vmatprep.mubr.msk.bf16.mxu1 %vm387_vm0, %v467_v36 }
  0xe8   : > { %1338 = vmatmul.mubr.msk.bf16.gmra.mxu1 %vm387_vm0, %v468_v37 }
 0x1a0   : > { %v1335_v40 = vpop.f32.mrf.mxu1 }
 0x1a1   : > { %v542_v46 = vadd.f32 %v1335_v40, %v1615_v42 }
 0x1a2   : > { %v533_v41 = vpop.f32.mrf.mxu1 }
 0x1a3   : > { %v534_v44 = vadd.f32 %v1615_v42, %v533_v41  ;;  %v566_v53 = vmax.f32 %v542_v46, 0.0 }
 0x1a4   : > { %v1336_v43 = vpop.f32.mrf.mxu1 }
 0x1a5   : > { %v545_v45 = vadd.f32 %v1336_v43, %v1615_v42  ;;  %v564_v51 = vmax.f32 %v534_v44, 0.0 }
 0x1a6   : > { %v536_v47 = vpop.f32.mrf.mxu1 }
 0x1a7   : > { %v537_v48 = vadd.f32 %v1615_v42, %v536_v47  ;;  %v567_v49 = vmax.f32 %v545_v45, 0.0 }
 0x1a8   : > { %v1339_v50 = vpop.f32.mrf.mxu1 }
 0x1a9   : > { %v565_v52 = vmax.f32 %v537_v48, 0.0  ;;  %v573_v56 = vpack.c.bf16 %v567_v49, %v566_v53  ;;  %v558_v60 = vadd.f32 %v1339_v50, %v1615_v42 }
 0x1aa   : > { %v549_v54 = vpop.f32.mrf.mxu1 }
 0x1ab   : > { %v572_v55 = vpack.c.bf16 %v565_v52, %v564_v51  ;;  %v550_v58 = vadd.f32 %v1615_v42, %v549_v54  ;;  %v570_v6 = vmax.f32 %v558_v60, 0.0 }
 0x1ac   : > { %v1340_v57 = vpop.f32.mrf.mxu1 }
 0x1ad   : > { %v561_v59 = vadd.f32 %v1340_v57, %v1615_v42  ;;  %1345 = vmatprep.mubr.msk.bf16.mxu0 %vm387_vm0, %v572_v55  ;;  %v568_v4 = vmax.f32 %v550_v58, 0.0 }
 0x1ae   : > { %v552_v61 = vpop.f32.mrf.mxu1  ;;  %1346 = vmatmul.mubr.msk.bf16.vlgmr.msra.gmra.mxu0 %vm387_vm0, %v573_v56 }
 0x1af   : > { %v553_v62 = vadd.f32 %v1615_v42, %v552_v61  ;;  %1366 = vmatpush3.bf16.msra.mxu0 %v1530_v0  ;;  %v571_v63 = vmax.f32 %v561_v59, 0.0  ;;  %v796_v0 = vld [vmem:[%s1548_s19 + $0x50] sm:$0xff] }
 0x1b0   : > { %1367 = vmatprep.subr.bf16.mxu0 %v1535_v1  ;;  %v803_v13 = vpack.c.bf16 %v797_v10, %v796_v0 }
 0x1b1   : > { %v569_v5 = vmax.f32 %v553_v62, 0.0  ;;  %v575_v9 = vpack.c.bf16 %v571_v63, %v570_v6 }
 0x1b3   : > { %v574_v7 = vpack.c.bf16 %v569_v5, %v568_v4  ;;  %1368 = vmatpush3.bf16.msra.mxu0 %v1535_v1  ;;  %v800_v1 = vld [vmem:[%s1548_s19 + $0x70] sm:$0xff] }
 0x1b4   : > { %1389 = vmatprep.subr.bf16.mxu0 %v1580_v16  ;;  %v805_v19 = vpack.c.bf16 %v801_v18, %v800_v1 }
 0x1b5   : > { %1349 = vmatprep.mubr.msk.bf16.mxu0 %vm387_vm0, %v574_v7 }
 0x1b6   : > { %1350 = vmatmul.mubr.msk.bf16.gmra.mxu0 %vm387_vm0, %v575_v9 }
 0x1b7   : > { %1369 = vmatprep.mubr.msk.bf16.mxu0 %vm387_vm0, %v802_v8  ;;  %v1693_v8 = vld [vmem:[%s1769_s8] ss:$0 sm:$0xff] }
 0x1be   : > { %1370 = vmatmul.mubr.msk.bf16.vlgmr.msra.gmra.mxu0 %vm387_vm0, %v803_v13 }
 0x1bf   : > { %1373 = vmatprep.mubr.msk.bf16.mxu0 %vm387_vm0, %v804_v17  ;;  %1390 = vmatpush3.bf16.msra.mxu0 %v1580_v16  ;;  %v1657_v16 = vld [vmem:[%s1767_s6] ss:$0 sm:$0xff] }
 0x1c0   : > { %1391 = vmatprep.subr.bf16.mxu0 %v1426_v38 }
 0x1c3   : > { %1392 = vmatpush3.bf16.msra.mxu0 %v1426_v38 }
 0x1c6   : > { %1374 = vmatmul.mubr.msk.bf16.gmra.mxu0 %vm387_vm0, %v805_v19 }
 0x26e   : > { %v1347_v22 = vpop.f32.mrf.mxu0 }
 0x26f   : > { %v649_v27 = vadd.f32 %v1347_v22, %v1657_v16 }
 0x270   : > { %v640_v23 = vpop.f32.mrf.mxu0 }
 0x271   : > { %v641_v25 = vadd.f32 %v1657_v16, %v640_v23  ;;  %v673_v34 = vmax.f32 %v649_v27, 0.0 }
 0x272   : > { %v1348_v24 = vpop.f32.mrf.mxu0 }
 0x273   : > { %v652_v26 = vadd.f32 %v1348_v24, %v1657_v16  ;;  %v671_v32 = vmax.f32 %v641_v25, 0.0 }
 0x274   : > { %v643_v28 = vpop.f32.mrf.mxu0 }
 0x275   : > { %v644_v29 = vadd.f32 %v1657_v16, %v643_v28  ;;  %v674_v30 = vmax.f32 %v652_v26, 0.0 }
 0x276   : > { %v1351_v31 = vpop.f32.mrf.mxu0 }
 0x277   : > { %v672_v33 = vmax.f32 %v644_v29, 0.0  ;;  %v680_v37 = vpack.c.bf16 %v674_v30, %v673_v34  ;;  %v665_v43 = vadd.f32 %v1351_v31, %v1657_v16 }
 0x278   : > { %v656_v35 = vpop.f32.mrf.mxu0 }
 0x279   : > { %v679_v36 = vpack.c.bf16 %v672_v33, %v671_v32  ;;  %v657_v40 = vadd.f32 %v1657_v16, %v656_v35  ;;  %v677_v50 = vmax.f32 %v665_v43, 0.0 }
 0x27a   : > { %v1352_v38 = vpop.f32.mrf.mxu0 }
 0x27b   : > { %v668_v41 = vadd.f32 %v1352_v38, %v1657_v16  ;;  %1357 = vmatprep.mubr.msk.bf16.mxu1 %vm387_vm0, %v679_v36  ;;  %v675_v48 = vmax.f32 %v657_v40, 0.0 }
 0x27c   : > { %v659_v44 = vpop.f32.mrf.mxu0  ;;  %1358 = vmatmul.mubr.msk.bf16.vlgmr.msra.gmra.mxu1 %vm387_vm0, %v680_v37 }
 0x27d   : > { %v660_v45 = vadd.f32 %v1657_v16, %v659_v44  ;;  %1378 = vmatpush3.bf16.msra.mxu1 %v1566_v14  ;;  %v678_v46 = vmax.f32 %v668_v41, 0.0 }
 0x27e   : > { %v1371_v47 = vpop.f32.mrf.mxu0  ;;  %1379 = vmatprep.subr.bf16.mxu1 %v1573_v15 }
 0x27f   : > { %v676_v49 = vmax.f32 %v660_v45, 0.0  ;;  %v682_v53 = vpack.c.bf16 %v678_v46, %v677_v50  ;;  %v861_v60 = vadd.f32 %v1371_v47, %v1587_v20 }
 0x280   : > { %v852_v51 = vpop.f32.mrf.mxu0 }
 0x281   : > { %v681_v52 = vpack.c.bf16 %v676_v49, %v675_v48  ;;  %1380 = vmatpush3.bf16.msra.mxu1 %v1573_v15  ;;  %v853_v55 = vadd.f32 %v1587_v20, %v852_v51 }
 0x282   : > { %v1372_v54 = vpop.f32.mrf.mxu0  ;;  %1401 = vmatprep.subr.bf16.mxu1 %v1608_v39 }
 0x283   : > { %1361 = vmatprep.mubr.msk.bf16.mxu1 %vm387_vm0, %v681_v52  ;;  %v864_v57 = vadd.f32 %v1372_v54, %v1587_v20 }
 0x284   : > { %1362 = vmatmul.mubr.msk.bf16.gmra.mxu1 %vm387_vm0, %v682_v53  ;;  %v855_v14 = vpop.f32.mrf.mxu0 }
 0x285   : > { %v856_v56 = vadd.f32 %v1587_v20, %v855_v14  ;;  %v884_v61 = vpack.c.bf16 %v864_v57, %v861_v60 }
 0x286   : > { %v1375_v58 = vpop.f32.mrf.mxu0 }
 0x287   : > { %v883_v59 = vpack.c.bf16 %v856_v56, %v853_v55  ;;  %v877_v6 = vadd.f32 %v1375_v58, %v1587_v20 }
 0x288   : > { %v868_v15 = vpop.f32.mrf.mxu0 }
 0x289   : > { %1381 = vmatprep.mubr.msk.bf16.mxu1 %vm387_vm0, %v883_v59  ;;  %v869_v2 = vadd.f32 %v1587_v20, %v868_v15 }
 0x28a   : > { %v1376_v62 = vpop.f32.mrf.mxu0 }
 0x28b   : > { %v880_v4 = vadd.f32 %v1376_v62, %v1587_v20 }
 0x28c   : > { %v871_v63 = vpop.f32.mrf.mxu0  ;;  %1382 = vmatmul.mubr.msk.bf16.vlgmr.msra.gmra.mxu1 %vm387_vm0, %v884_v61 }
 0x28d   : > { %v872_v3 = vadd.f32 %v1587_v20, %v871_v63  ;;  %1402 = vmatpush3.bf16.msra.mxu1 %v1608_v39  ;;  %v886_v7 = vpack.c.bf16 %v880_v4, %v877_v6 }
 0x28e   : > { %1403 = vmatprep.subr.bf16.mxu1 %v1649_v21 }
 0x28f   : > { %v885_v5 = vpack.c.bf16 %v872_v3, %v869_v2 }
 0x291   : > { %1385 = vmatprep.mubr.msk.bf16.mxu1 %vm387_vm0, %v885_v5  ;;  %1404 = vmatpush3.bf16.msra.mxu1 %v1649_v21 }
 0x294   : > { %1386 = vmatmul.mubr.msk.bf16.gmra.mxu1 %vm387_vm0, %v886_v7 }
 0x33c   : > { %v1359_v39 = vpop.f32.mrf.mxu1 }
 0x33d   : > { %v756_v9 = vadd.f32 %v1359_v39, %v1693_v8 }
 0x33e   : > { %v747_v0 = vpop.f32.mrf.mxu1 }
 0x33f   : > { %1429 = vtanh.f32 %v756_v9  ;;  %v748_v10 = vadd.f32 %v1693_v8, %v747_v0 }
 0x340   : > { %v1360_v20 = vpop.f32.mrf.mxu1 }
 0x341   : > { %1431 = vtanh.f32 %v748_v10  ;;  %v759_v11 = vadd.f32 %v1360_v20, %v1693_v8 }
 0x342   : > { %v750_v12 = vpop.f32.mrf.mxu1 }
 0x343   : > { %1433 = vtanh.f32 %v759_v11  ;;  %v751_v13 = vadd.f32 %v1693_v8, %v750_v12 }
 0x344   : > { %v1363_v17 = vpop.f32.mrf.mxu1 }
 0x345   : > { %1435 = vtanh.f32 %v751_v13  ;;  %v772_v1 = vadd.f32 %v1363_v17, %v1693_v8 }
 0x346   : > { %v763_v18 = vpop.f32.mrf.mxu1 }
 0x347   : > { %1437 = vtanh.f32 %v772_v1  ;;  %v764_v19 = vadd.f32 %v1693_v8, %v763_v18 }
 0x348   : > { %v1364_v21 = vpop.f32.mrf.mxu1 }
 0x349   : > { %1439 = vtanh.f32 %v764_v19  ;;  %v775_v22 = vadd.f32 %v1364_v21, %v1693_v8 }
 0x34a   : > { %v766_v23 = vpop.f32.mrf.mxu1 }
 0x34b   : > { %1441 = vtanh.f32 %v775_v22  ;;  %v767_v24 = vadd.f32 %v1693_v8, %v766_v23 }
 0x34c   : > { %v1430_v25 = vpop.eup %1429  ;;  %v1383_v26 = vpop.f32.mrf.mxu1 }
 0x34d   : > { %788 = vst [vmem:[%s1707_s24 + $0x10] sm:$0xff] %v1430_v25  ;;  %1443 = vtanh.f32 %v767_v24  ;;  %v942_v34 = vadd.f32 %v1383_v26, %v1615_v42 }
 0x34e   : > { %v1432_v27 = vpop.eup %1431  ;;  %v933_v28 = vpop.f32.mrf.mxu1 }
 0x34f   : > { %786 = vst [vmem:[%s1707_s24] sm:$0xff] %v1432_v27  ;;  %v934_v31 = vadd.f32 %v1615_v42, %v933_v28  ;;  %v966_v45 = vmax.f32 %v942_v34, 0.0 }
 0x350   : > { %v1434_v29 = vpop.eup %1433  ;;  %v1384_v30 = vpop.f32.mrf.mxu1 }
 0x351   : > { %789 = vst [vmem:[%s1707_s24 + $0x18] sm:$0xff] %v1434_v29  ;;  %v945_v32 = vadd.f32 %v1384_v30, %v1615_v42  ;;  %v964_v41 = vmax.f32 %v934_v31, 0.0 }
 0x352   : > { %v1436_v33 = vpop.eup %1435  ;;  %v936_v35 = vpop.f32.mrf.mxu1 }
 0x353   : > { %787 = vst [vmem:[%s1707_s24 + $0x8] sm:$0xff] %v1436_v33  ;;  %v937_v36 = vadd.f32 %v1615_v42, %v936_v35  ;;  %v967_v38 = vmax.f32 %v945_v32, 0.0 }
 0x354   : > { %v1438_v37 = vpop.eup %1437  ;;  %v1387_v40 = vpop.f32.mrf.mxu1 }
 0x355   : > { %792 = vst [vmem:[%s1707_s24 + $0x30] sm:$0xff] %v1438_v37  ;;  %v965_v43 = vmax.f32 %v937_v36, 0.0  ;;  %v973_v49 = vpack.c.bf16 %v967_v38, %v966_v45  ;;  %v958_v54 = vadd.f32 %v1387_v40, %v1615_v42 }
 0x356   : > { %v1440_v44 = vpop.eup %1439  ;;  %v949_v46 = vpop.f32.mrf.mxu1 }
 0x357   : > { %790 = vst [vmem:[%s1707_s24 + $0x20] sm:$0xff] %v1440_v44  ;;  %v972_v47 = vpack.c.bf16 %v965_v43, %v964_v41  ;;  %v950_v51 = vadd.f32 %v1615_v42, %v949_v46  ;;  %v970_v59 = vmax.f32 %v958_v54, 0.0 }
 0x358   : > { %v1442_v48 = vpop.eup %1441  ;;  %v1388_v50 = vpop.f32.mrf.mxu1 }
 0x359   : > { %793 = vst [vmem:[%s1707_s24 + $0x38] sm:$0xff] %v1442_v48  ;;  %v961_v52 = vadd.f32 %v1388_v50, %v1615_v42  ;;  %1393 = vmatprep.mubr.msk.bf16.mxu0 %vm387_vm0, %v972_v47  ;;  %v968_v57 = vmax.f32 %v950_v51, 0.0 }
 0x35a   : > { %v1444_v53 = vpop.eup %1443  ;;  %v952_v14 = vpop.f32.mrf.mxu1  ;;  %1394 = vmatmul.mubr.msk.bf16.vlgmr.msra.gmra.mxu0 %vm387_vm0, %v973_v49 }
 0x35b   : > { %791 = vst [vmem:[%s1707_s24 + $0x28] sm:$0xff] %v1444_v53  ;;  %v953_v55 = vadd.f32 %v1615_v42, %v952_v14  ;;  %v971_v56 = vmax.f32 %v961_v52, 0.0 }
 0x35d   : > { %v969_v58 = vmax.f32 %v953_v55, 0.0  ;;  %v975_v15 = vpack.c.bf16 %v971_v56, %v970_v59 }
 0x35f   : > { %v974_v60 = vpack.c.bf16 %v969_v58, %v968_v57 }
 0x361   : > { %1397 = vmatprep.mubr.msk.bf16.mxu0 %vm387_vm0, %v974_v60 }
 0x362   : > { %1398 = vmatmul.mubr.msk.bf16.gmra.mxu0 %vm387_vm0, %v975_v15 }
 0x41a   : > { %v1395_v61 = vpop.f32.mrf.mxu0 }
 0x41b   : > { %v1031_v4 = vadd.f32 %v1395_v61, %v1657_v16 }
 0x41c   : > { %v1022_v62 = vpop.f32.mrf.mxu0 }
 0x41d   : > { %v1023_v2 = vadd.f32 %v1657_v16, %v1022_v62  ;;  %v1055_v0 = vmax.f32 %v1031_v4, 0.0 }
 0x41e   : > { %v1396_v63 = vpop.f32.mrf.mxu0 }
 0x41f   : > { %v1034_v3 = vadd.f32 %v1396_v63, %v1657_v16  ;;  %v1053_v39 = vmax.f32 %v1023_v2, 0.0 }
 0x420   : > { %v1025_v42 = vpop.f32.mrf.mxu0 }
 0x421   : > { %v1026_v5 = vadd.f32 %v1657_v16, %v1025_v42  ;;  %v1056_v6 = vmax.f32 %v1034_v3, 0.0 }
 0x422   : > { %v1399_v7 = vpop.f32.mrf.mxu0 }
 0x423   : > { %v1054_v9 = vmax.f32 %v1026_v5, 0.0  ;;  %v1062_v11 = vpack.c.bf16 %v1056_v6, %v1055_v0  ;;  %v1047_v1 = vadd.f32 %v1399_v7, %v1657_v16 }
 0x424   : > { %v1038_v10 = vpop.f32.mrf.mxu0 }
 0x425   : > { %v1061_v20 = vpack.c.bf16 %v1054_v9, %v1053_v39  ;;  %v1039_v13 = vadd.f32 %v1657_v16, %v1038_v10  ;;  %v1059_v24 = vmax.f32 %v1047_v1, 0.0 }
 0x426   : > { %v1400_v12 = vpop.f32.mrf.mxu0 }
 0x427   : > { %v1050_v17 = vadd.f32 %v1400_v12, %v1657_v16  ;;  %1405 = vmatprep.mubr.msk.bf16.mxu1 %vm387_vm0, %v1061_v20  ;;  %v1057_v22 = vmax.f32 %v1039_v13, 0.0 }
 0x428   : > { %v1041_v18 = vpop.f32.mrf.mxu0  ;;  %1406 = vmatmul.mubr.msk.bf16.vlgmr.msra.gmra.mxu1 %vm387_vm0, %v1062_v11 }
 0x429   : > { %v1042_v19 = vadd.f32 %v1657_v16, %v1041_v18  ;;  %v1060_v21 = vmax.f32 %v1050_v17, 0.0 }
 0x42b   : > { %v1058_v23 = vmax.f32 %v1042_v19, 0.0  ;;  %v1064_v26 = vpack.c.bf16 %v1060_v21, %v1059_v24 }
 0x42d   : > { %v1063_v25 = vpack.c.bf16 %v1058_v23, %v1057_v22 }
 0x42f   : > { %1409 = vmatprep.mubr.msk.bf16.mxu1 %vm387_vm0, %v1063_v25 }
 0x430   : > { %1410 = vmatmul.mubr.msk.bf16.gmra.mxu1 %vm387_vm0, %v1064_v26 }
 0x4e8   : > { %v1407_v27 = vpop.f32.mrf.mxu1 }
 0x4e9   : > { %v1120_v28 = vadd.f32 %v1407_v27, %v1693_v8 }
 0x4ea   : > { %v1111_v29 = vpop.f32.mrf.mxu1 }
 0x4eb   : > { %1445 = vtanh.f32 %v1120_v28  ;;  %v1112_v30 = vadd.f32 %v1693_v8, %v1111_v29 }
 0x4ec   : > { %v1408_v31 = vpop.f32.mrf.mxu1 }
 0x4ed   : > { %1447 = vtanh.f32 %v1112_v30  ;;  %v1123_v16 = vadd.f32 %v1408_v31, %v1693_v8 }
 0x4ee   : > { %v1114_v32 = vpop.f32.mrf.mxu1 }
 0x4ef   : > { %1449 = vtanh.f32 %v1123_v16  ;;  %v1115_v33 = vadd.f32 %v1693_v8, %v1114_v32 }
 0x4f0   : > { %v1411_v34 = vpop.f32.mrf.mxu1 }
 0x4f1   : > { %1451 = vtanh.f32 %v1115_v33  ;;  %v1136_v35 = vadd.f32 %v1411_v34, %v1693_v8 }
 0x4f2   : > { %v1127_v36 = vpop.f32.mrf.mxu1 }
 0x4f3   : > { %1453 = vtanh.f32 %v1136_v35  ;;  %v1128_v37 = vadd.f32 %v1693_v8, %v1127_v36 }
 0x4f4   : > { %v1412_v38 = vpop.f32.mrf.mxu1 }
 0x4f5   : > { %1455 = vtanh.f32 %v1128_v37  ;;  %v1139_v40 = vadd.f32 %v1412_v38, %v1693_v8 }
 0x4f6   : > { %v1130_v41 = vpop.f32.mrf.mxu1 }
 0x4f7   : > { %1457 = vtanh.f32 %v1139_v40  ;;  %v1131_v43 = vadd.f32 %v1693_v8, %v1130_v41 }
 0x4f8   : > { %v1446_v44 = vpop.eup %1445 }
 0x4f9   : > { %1152 = vst [vmem:[%s1707_s24 + $0x50] sm:$0xff] %v1446_v44  ;;  %1459 = vtanh.f32 %v1131_v43 }
 0x4fa   : > { %v1448_v45 = vpop.eup %1447 }
 0x4fb   : > { %1150 = vst [vmem:[%s1707_s24 + $0x40] sm:$0xff] %v1448_v45 }
 0x4fc   : > { %v1450_v46 = vpop.eup %1449 }
 0x4fd   : > { %1153 = vst [vmem:[%s1707_s24 + $0x58] sm:$0xff] %v1450_v46 }
 0x4fe   : > { %v1452_v47 = vpop.eup %1451 }
 0x4ff   : > { %1151 = vst [vmem:[%s1707_s24 + $0x48] sm:$0xff] %v1452_v47 }
 0x500   : > { %v1454_v48 = vpop.eup %1453 }
 0x501   : > { %1156 = vst [vmem:[%s1707_s24 + $0x70] sm:$0xff] %v1454_v48 }
 0x502   : > { %v1456_v49 = vpop.eup %1455 }
 0x503   : > { %1154 = vst [vmem:[%s1707_s24 + $0x60] sm:$0xff] %v1456_v49 }
 0x504   : > { %v1458_v50 = vpop.eup %1457 }
 0x505   : > { %1157 = vst [vmem:[%s1707_s24 + $0x78] sm:$0xff] %v1458_v50 }
 0x506   : > { %v1460_v51 = vpop.eup %1459 }
 0x507   : > { %1155 = vst [vmem:[%s1707_s24 + $0x68] sm:$0xff] %v1460_v51 }
 0x508 PF: > { %s19_s30 = sadd.s32 1, %s1467_s30  }
 0x509   : > { %p16_p4 = scmp.ge.s32.totalorder %s19_s30, 6  }
 0x50b   :  { %18 = sbr.rel (!%p16_p4) target bundleno = 1 (0x1), region = 86 }

</bundles_post_ra>
